<compile_context>
chip_gen: v6e
topology: v6e:2x2x1
jax: 0.10.0
libtpu: 0.0.40
codegen_flags: <defaults>
</compile_context>

<pallas_src>
import functools

import jax
import jax.numpy as jnp
from jax.experimental import pallas as pl
from jax.experimental.pallas import tpu as pltpu


# Fixed hidden sizes from the module definition.
_H1, _H2, _HOUT = 16, 8, 1
_SLAB_ROWS, _SLAB_COLS = 32, 128        # single packed parameter block (f32, 16 KiB)
_BIAS_COL = _SLAB_COLS - 1              # biases live in the last slab column
_W3_ROW = _H1 + _H2                     # row 24 holds W3 / b3


def _round_up(v: int, m: int) -> int:
    return (v + m - 1) // m * m


def _choose_tile_b(batch: int, target_tile: int = 16384) -> int:
    """Large, clamped batch tile (multiple of 256).

    * Clamped so we never overshoot the real batch by more than one tile.
    * Aims for >=2 grid tiles whenever batch > 256 so v7x's two TensorCores
      both get work (for batch <= 256 a single-tile grid is fine everywhere).
    * Capped at `target_tile` so the double-buffered activation stream stays a
      few MiB of VMEM on every generation (v5e 16 MiB / v6e 32 MiB scoped,
      v7x 64 MiB physical).
    """
    b_ceil = max(_round_up(batch, 256), 256)
    if b_ceil <= 256:
        return 256
    half = _round_up(b_ceil // 2, 256)
    return min(target_tile, half)


def _make_mlp_kernel(in_dim: int):
    """Fused 3-layer MLP kernel for a given input-feature count."""

    def kernel(p_ref, x_ref, o_ref):
        # x_ref: (in_dim, TB) feature-major; batch is the lane axis.
        x = x_ref[...]

        # Static slices of the packed parameter slab (fetched into VMEM once,
        # thanks to the constant index_map).
        w1 = p_ref[0:_H1, 0:in_dim].astype(x.dtype)             # (16, in_dim)
        b1 = p_ref[0:_H1, _BIAS_COL:_BIAS_COL + 1]              # (16, 1) f32
        w2 = p_ref[_H1:_H1 + _H2, 0:_H1]                        # (8, 16)
        b2 = p_ref[_H1:_H1 + _H2, _BIAS_COL:_BIAS_COL + 1]      # (8, 1)
        w3 = p_ref[_W3_ROW:_W3_ROW + 1, 0:_H2]                  # (1, 8)
        b3 = p_ref[_W3_ROW:_W3_ROW + 1, _BIAS_COL:_BIAS_COL + 1]  # (1, 1)

        # Layer 1: (16, in_dim) @ (in_dim, TB) -> (16, TB); bf16 MXU operands when
        # streaming bf16 activations, f32 accumulation either way.
        h1 = jnp.maximum(
            jnp.dot(w1, x, preferred_element_type=jnp.float32) + b1, 0.0)
        # Layer 2: (8, 16) @ (16, TB) -> (8, TB)
        h2 = jnp.maximum(
            jnp.dot(w2, h1, preferred_element_type=jnp.float32) + b2, 0.0)
        # Layer 3: (1, 8) @ (8, TB) -> (1, TB)
        z = jnp.dot(w3, h2, preferred_element_type=jnp.float32) + b3

        # Exact sigmoid: EUP exp + a single-row divide (negligible); keeps the
        # output a strict probability in (0, 1).
        o_ref[...] = (1.0 / (1.0 + jnp.exp(-z))).astype(o_ref.dtype)

    return kernel


def _pack_params(params, in_dim: int):
    """Pack W1,b1,W2,b2,W3,b3 into one (32, 128) f32 slab.

    Layout (row, col):
      rows  0:16, cols 0:in_dim = W1 (16, in_dim)   rows  0:16, col 127 = b1
      rows 16:24, cols 0:16     = W2 (8, 16)        rows 16:24, col 127 = b2
      row  24,    cols 0:8      = W3 (1, 8)         row  24,    col 127 = b3
    Everything else is zero.
    """
    slab = jnp.zeros((_SLAB_ROWS, _SLAB_COLS), jnp.float32)
    slab = slab.at[0:_H1, 0:in_dim].set(params["w1"].T.astype(jnp.float32))
    slab = slab.at[0:_H1, _BIAS_COL].set(params["b1"].reshape(_H1).astype(jnp.float32))
    slab = slab.at[_H1:_H1 + _H2, 0:_H1].set(params["w2"].T.astype(jnp.float32))
    slab = slab.at[_H1:_H1 + _H2, _BIAS_COL].set(params["b2"].reshape(_H2).astype(jnp.float32))
    slab = slab.at[_W3_ROW:_W3_ROW + 1, 0:_H2].set(params["w3"].T.astype(jnp.float32))
    slab = slab.at[_W3_ROW:_W3_ROW + 1, _BIAS_COL:_BIAS_COL + 1].set(
        params["b3"].astype(jnp.float32))
    return slab


@functools.partial(jax.jit, static_argnames=("tile_b",))
def personality_model_forward_fm(x_fm, params, *, tile_b=None):
    """Fast path (primary API).

    x_fm: (in_dim, batch) feature-major, f32 or bf16 — batch on the minor axis.
    Returns (batch,) float32 probabilities (lane-dense 1-D output).

    The caller's array is blocked directly by the kernel; no transposed / padded
    copy of the activations is materialized in HBM.
    """
    in_dim, batch = x_fm.shape
    assert 1 <= in_dim < _BIAS_COL and in_dim <= _H1 * 4, "input_dim too large for the slab"
    if tile_b is None:
        tile_b = _choose_tile_b(batch)
    assert tile_b % 128 == 0 and tile_b > 0, "batch tile must be a multiple of 128"

    slab = _pack_params(params, in_dim)
    grid = (pl.cdiv(batch, tile_b),)   # last tile may be partial; Pallas clamps it

    out2d = pl.pallas_call(
        _make_mlp_kernel(in_dim),
        out_shape=jax.ShapeDtypeStruct((1, batch), jnp.float32),
        grid=grid,
        in_specs=[
            # Packed params: constant block index -> DMA'd once, stays resident.
            pl.BlockSpec((_SLAB_ROWS, _SLAB_COLS), lambda i: (0, 0)),
            # Activation stream: one lane-dense batch tile per grid step.
            pl.BlockSpec((in_dim, tile_b), lambda i: (0, i)),
        ],
        # Lane-dense (1, TB) output blocks.
        out_specs=pl.BlockSpec((1, tile_b), lambda i: (0, i)),
        compiler_params=pltpu.CompilerParams(
            # Batch tiles are independent: shard across both v7x TensorCores.
            dimension_semantics=("parallel",),
        ),
    )(slab, x_fm)

    return out2d[0]


def personality_model_forward(x, params, *, tile_b=None):
    """PyTorch-parity wrapper: x (batch, in_dim) f32/bf16 -> (batch, 1) f32.

    Note: this does one small XLA transpose of x to reach the feature-major
    layout; for peak throughput, hold activations feature-major and call
    personality_model_forward_fm directly (it does no relayout at all).
    """
    probs = personality_model_forward_fm(x.T, params, tile_b=tile_b)  # (batch,)
    return probs[:, None]


def init_params(key, input_dim: int = 7):
    """Deterministic synthetic parameters with PyTorch nn.Linear-like scaling.

    Weights stored as (in, out); biases as (1, out) (i.e. transposed vs torch)."""
    dims = [(input_dim, _H1), (_H1, _H2), (_H2, _HOUT)]
    params = {}
    for idx, (d_in, d_out) in enumerate(dims, start=1):
        key, kw, kb = jax.random.split(key, 3)
        bound = 1.0 / jnp.sqrt(d_in)
        params[f"w{idx}"] = jax.random.uniform(
            kw, (d_in, d_out), jnp.float32, minval=-bound, maxval=bound)
        params[f"b{idx}"] = jax.random.uniform(
            kb, (1, d_out), jnp.float32, minval=-bound, maxval=bound)
    return params


def _reference_forward(x, params):
    h1 = jnp.maximum(x @ params["w1"] + params["b1"], 0.0)
    h2 = jnp.maximum(h1 @ params["w2"] + params["b2"], 0.0)
    z = h2 @ params["w3"] + params["b3"]
    return jax.nn.sigmoid(z)


if __name__ == "__main__":
    key = jax.random.PRNGKey(0)
    key, kx = jax.random.split(key)

    batch, input_dim = 600, 7          # -> tile_b=512, grid of 2 tiles (one partial)
    x = jax.random.normal(kx, (batch, input_dim), jnp.float32)
    params = init_params(key, input_dim=input_dim)

    ref = _reference_forward(x, params)

    # Primary feature-major path: (in_dim, batch) in, lane-dense (batch,) out.
    x_fm = jnp.asarray(x.T)
    out_fm = jax.block_until_ready(personality_model_forward_fm(x_fm, params))
    assert out_fm.shape == (batch,)
    # Tolerance covers MXU vs XLA default f32-matmul precision differences.
    err_fm = float(jnp.max(jnp.abs(out_fm - ref[:, 0])))
    assert jnp.allclose(out_fm, ref[:, 0], atol=5e-3, rtol=0.0), err_fm

    # PyTorch-parity wrapper: (batch, in_dim) -> (batch, 1).
    out_2d = jax.block_until_ready(personality_model_forward(x, params))
    assert out_2d.shape == (batch, 1)
    assert jnp.allclose(out_2d, ref, atol=5e-3, rtol=0.0)

    # Optional bf16 activation streaming (halves the dominant HBM read).
    out_bf16 = jax.block_until_ready(
        personality_model_forward_fm(x_fm.astype(jnp.bfloat16), params))
    err_bf16 = float(jnp.max(jnp.abs(out_bf16 - ref[:, 0])))
    assert jnp.allclose(out_bf16, ref[:, 0], atol=5e-2, rtol=0.0), err_bf16

    print("KERNEL_OK")
</pallas_src>

<mosaic_0001>
module attributes {stable_mosaic.version = 11 : i64} {
  func.func @kernel(%arg0: i32, %arg1: memref<32x128xf32, #tpu.memory_space<vmem>>, %arg2: memref<7x512xf32, #tpu.memory_space<vmem>>, %arg3: memref<1x512xf32, #tpu.memory_space<vmem>>) attributes {dimension_semantics = [#tpu.dimension_semantics<parallel>], iteration_bounds = array<i64: 2>, scalar_prefetch = 0 : i64, scratch_operands = 0 : i64, tpu.core_type = #tpu.core_type<tc>, window_params = [{pipeline_mode = #tpu.pipeline_mode<synchronous>, transform_indices = @transform_0, window_bounds = array<i64: 32, 128>}, {transform_indices = @transform_1, window_bounds = array<i64: 7, 512>}, {transform_indices = @transform_2, window_bounds = array<i64: 1, 512>}]} {
    %c0 = arith.constant 0 : index
    %c0_0 = arith.constant 0 : index
    %0 = vector.load %arg2[%c0, %c0_0] : memref<7x512xf32, #tpu.memory_space<vmem>>, vector<7x512xf32>
    %c0_1 = arith.constant 0 : index
    %c0_2 = arith.constant 0 : index
    %1 = vector.load %arg1[%c0_1, %c0_2] : memref<32x128xf32, #tpu.memory_space<vmem>>, vector<16x7xf32>
    %c0_3 = arith.constant 0 : index
    %c127 = arith.constant 127 : index
    %2 = vector.load %arg1[%c0_3, %c127] : memref<32x128xf32, #tpu.memory_space<vmem>>, vector<16x1xf32>
    %c16 = arith.constant 16 : index
    %c0_4 = arith.constant 0 : index
    %3 = vector.load %arg1[%c16, %c0_4] : memref<32x128xf32, #tpu.memory_space<vmem>>, vector<8x16xf32>
    %c16_5 = arith.constant 16 : index
    %c127_6 = arith.constant 127 : index
    %4 = vector.load %arg1[%c16_5, %c127_6] : memref<32x128xf32, #tpu.memory_space<vmem>>, vector<8x1xf32>
    %c24 = arith.constant 24 : index
    %c0_7 = arith.constant 0 : index
    %5 = vector.load %arg1[%c24, %c0_7] : memref<32x128xf32, #tpu.memory_space<vmem>>, vector<1x8xf32>
    %c24_8 = arith.constant 24 : index
    %c127_9 = arith.constant 127 : index
    %6 = vector.load %arg1[%c24_8, %c127_9] : memref<32x128xf32, #tpu.memory_space<vmem>>, vector<1x1xf32>
    %cst = arith.constant dense<0.000000e+00> : vector<16x512xf32>
    %7 = tpu.matmul %1, %0, %cst {dimension_numbers = #tpu.dot_dimension_numbers<[1], [0], [0], [1], [0, 0, 1, 1], [], []>} : vector<16x7xf32>, vector<7x512xf32>, vector<16x512xf32> -> vector<16x512xf32>
    %8 = vector.broadcast %2 : vector<16x1xf32> to vector<16x512xf32>
    %9 = arith.addf %7, %8 : vector<16x512xf32>
    %cst_10 = arith.constant 0.000000e+00 : f32
    %10 = vector.broadcast %cst_10 : f32 to vector<16x512xf32>
    %11 = arith.maximumf %9, %10 : vector<16x512xf32>
    %cst_11 = arith.constant dense<0.000000e+00> : vector<8x512xf32>
    %12 = tpu.matmul %3, %11, %cst_11 {dimension_numbers = #tpu.dot_dimension_numbers<[1], [0], [0], [1], [0, 0, 1, 1], [], []>} : vector<8x16xf32>, vector<16x512xf32>, vector<8x512xf32> -> vector<8x512xf32>
    %13 = vector.broadcast %4 : vector<8x1xf32> to vector<8x512xf32>
    %14 = arith.addf %12, %13 : vector<8x512xf32>
    %cst_12 = arith.constant 0.000000e+00 : f32
    %15 = vector.broadcast %cst_12 : f32 to vector<8x512xf32>
    %16 = arith.maximumf %14, %15 : vector<8x512xf32>
    %cst_13 = arith.constant dense<0.000000e+00> : vector<1x512xf32>
    %17 = tpu.matmul %5, %16, %cst_13 {dimension_numbers = #tpu.dot_dimension_numbers<[1], [0], [0], [1], [0, 0, 1, 1], [], []>} : vector<1x8xf32>, vector<8x512xf32>, vector<1x512xf32> -> vector<1x512xf32>
    %18 = vector.broadcast %6 : vector<1x1xf32> to vector<1x512xf32>
    %19 = arith.addf %17, %18 : vector<1x512xf32>
    %cst_14 = arith.constant 0.000000e+00 : f32
    %20 = vector.broadcast %cst_14 : f32 to vector<1x512xf32>
    %21 = arith.subf %20, %19 : vector<1x512xf32>
    %22 = math.exp %21 : vector<1x512xf32>
    %cst_15 = arith.constant 1.000000e+00 : f32
    %23 = vector.broadcast %cst_15 : f32 to vector<1x512xf32>
    %24 = arith.addf %23, %22 : vector<1x512xf32>
    %cst_16 = arith.constant 1.000000e+00 : f32
    %25 = vector.broadcast %cst_16 : f32 to vector<1x512xf32>
    %26 = arith.divf %25, %24 : vector<1x512xf32>
    %c0_17 = arith.constant 0 : index
    %c0_18 = arith.constant 0 : index
    %27 = vector.load %arg3[%c0_17, %c0_18] : memref<1x512xf32, #tpu.memory_space<vmem>>, vector<1x512xf32>
    tpu.vector_store %arg3[%c0_17, %c0_18], %26 {strides = array<i32>} : memref<1x512xf32, #tpu.memory_space<vmem>>, vector<1x512xf32>,
    return
  }
  func.func @transform_0(%arg0: i32) -> (i32, i32) {
    %c0_i32 = arith.constant 0 : i32
    %c0_i32_0 = arith.constant 0 : i32
    %c0_i32_1 = arith.constant 0 : i32
    return %c0_i32, %c0_i32_0 : i32, i32
  }
  func.func @transform_1(%arg0: i32) -> (i32, i32) {
    %c0_i32 = arith.constant 0 : i32
    %c0_i32_0 = arith.constant 0 : i32
    return %c0_i32, %arg0 : i32, i32
  }
  func.func @transform_2(%arg0: i32) -> (i32, i32) {
    %c0_i32 = arith.constant 0 : i32
    %c0_i32_0 = arith.constant 0 : i32
    return %c0_i32, %arg0 : i32, i32
  }
}

</mosaic_0001>

<bundles_post_ra>
// kernel: personality_model_forward_fm.1
= control target key start
LH: loop header
LB: loop body
LE: loop exit
PB: predicated region body
PF: predicated region fallthrough
CT: control target
= control target key end

     0   :  { %s1673_s9 = smov 0   ;;  %s1675_s10 = smov 0   ;;  %s2153_s0 = inlined_call_operand.vmem [shape: f32[32,128], index: 0, kind: input, shape index: {}]   ;;  %s2154_s1 = inlined_call_operand.vmem [shape: f32[7,600], index: 1, kind: input, shape index: {}]   ;;  %s2155_s2 = inlined_call_operand.vmem [shape: f32[1,600], index: 2, kind: output, shape index: {}]  }
   0x1   :  { %s1677_s11 = smov 0  }
   0x2 LB: > { %s1273_s12 = sadd.s32 4294967295, %s1587_s11   ;;  %s1686_s13 = sadd.s32 1, %s1587_s11   ;;  %s1587_s11 = sphi %s1677_s11, %s2169_s11   ;;  %s1583_s10 = sphi %s1675_s10, %s2168_s10   ;;  %s1579_s9 = sphi %s1673_s9, %s2167_s9  }
   0x3   : > { %s63_s14 = ssub.s32 %s1587_s11, %s1686_s13  ;;  %s66_s15 = sadd.s32 1, %s1583_s10 }
   0x4   : > { %p64_p0 = scmp.eq.s32.totalorder %s63_s14, 0  ;;  %p76_p1 = scmp.ne.s32.totalorder %s1583_s10, %s1579_s9 }
   0x5   : > { %p77_p2 = scmp.eq.s32.totalorder %s1273_s12, 1  ;;  %p1277_p3 = scmp.ge.s32.totalorder %s1587_s11, 1 }
   0x6   : > { %s1693_s16 = scalar_select %p64_p0, %s1583_s10, %s66_s15  }
   0x7   : > { %p1695_p4 = por %p77_p2, %p76_p1  ;;  %p121_p5 = scmp.lt.s32.totalorder %s1587_s11, 3 }
   0x9   : > { %p122_p6 = pnand %p1277_p3, %p121_p5 }
   0xa   : > { %s1699_s18 = sshll.u32 (!%p122_p6), %s1273_s12, 2  ;;  %s143_s4 = sand.u32 (!%p122_p6), 1, %s1579_s9  }
   0xb   : > { %125 = sbr.rel (%p122_p6) target bundleno = 818 (0x332), region = 28  ;;  %p151_p7 = scmp.lt.s32.totalorder (!%p122_p6), %s1699_s18, 4 }
   0xc   : > { %s1278_s5 = sshll.u32 (!%p122_p6), %s143_s4, 2 }
   0xd   : > { %s1727_s6 = scalar_lea.vmem (!%p122_p6), [#allocation2], %s1278_s5  }
  0x10   : > { %v1653_v0 = vmov 0.0   ;;  %v170_v1 = vld [vmem:[%s2153_s0 + $0x8] sm:$0xff]  ;;  %v1654_v2 = vmov 127   ;;  %s152_s21 = scalar_select %p151_p7, %s1699_s18, 4  ;;  %vm188_vm0 = vcmask 1046528   ;;  %v169_v3 = vld [vmem:[%s2153_s0] sm:$0xff] }
  0x11   : > { %265 = vmatprep.mubr.f32.mxu0 %v1653_v0  ;;  %342 = vmatprep.mubr.f32.mxu1 %v1653_v0  ;;  %vm183_vm1 = vcmask 56320   ;;  %v171_v8 = vld [vmem:[%s2153_s0 + $0x10] sm:$0xff]  ;;  %v172_v9 = vld [vmem:[%s2153_s0 + $0x18] sm:$0x1]  ;;  %vm368_vm2 = vcmask 130048   ;;  %vm522_vm3 = vcmask 64512   ;;  %s1737_s9 = scalar_lea.vmem (%p1695_p4), %s2155_s2, %s1699_s18  }
  0x12   : > { %1483 = vset.pattern.permute.xlu0 %v1654_v2  ;;  %1484 = vset.pattern.permute.xlu1 %v1654_v2  ;;  %s1280_s22 = sshll.u32 %s152_s21, 3  ;;  %s733_s7 = ssub.s32 (%p1695_p4), 5, %s1699_s18 }
  0x13   : > { %180 = vperm.xlu0 %1483, %v170_v1   ;;  %s154_s25 = scalar_lea.vmem %s2154_s1, %s1280_s22  ;;  %365 = vperm.xlu1 %1484, %v171_v8   ;;  %p734_p8 = scmp.lt.s32.totalorder (%p1695_p4), %s733_s7, 4 }
  0x14   : > { %v166_v4 = vld [vmem:[%s154_s25 + $0x8] sm:$0x7f]  ;;  %v168_v5 = vld [vmem:[%s154_s25 + $0x18] sm:$0x7f]  ;;  %v165_v6 = vld [vmem:[%s154_s25] sm:$0x7f] }
  0x15   : > { %1281 = vmatprep.subr.msk.mxu0 %vm188_vm0, %v166_v4  ;;  %1285 = vmatprep.subr.msk.mxu1 %vm188_vm0, %v168_v5  ;;  %v167_v7 = vld [vmem:[%s154_s25 + $0x10] sm:$0x7f] }
  0x16   : > { %1282 = vmatpush1.msk.msra.mxu0 %vm188_vm0, %v165_v6  ;;  %1286 = vmatpush1.msk.msra.mxu1 %vm188_vm0, %v167_v7 }
  0x17   : > { %175 = vperm.xlu0 %1483, %v169_v3   ;;  %1283 = vmatmul.mubr.msk.f32.vlgmr.msra.gmra.mxu0 %vm183_vm1, %v169_v3 }
  0x18   : > { %1287 = vmatmul.mubr.msk.f32.vlgmr.msra.gmra.mxu1 %vm183_vm1, %v169_v3  ;;  %271 = vmatprep.mubr.f32.mxu0 %v1653_v0 }
  0x19   : > { %348 = vmatprep.mubr.f32.mxu1 %v1653_v0  ;;  %519 = vperm.xlu1 %1484, %v172_v9  }
  0x1b   : > { %1284 = vmatmul.mubr.msk.f32.gmra.mxu0 %vm183_vm1, %v170_v1 }
  0x1c   : > { %1288 = vmatmul.mubr.msk.f32.gmra.mxu1 %vm183_vm1, %v170_v1  ;;  %435 = vmatprep.mubr.f32.mxu0 %v1653_v0 }
  0x1d   : > { %506 = vmatprep.mubr.f32.mxu1 %v1653_v0 }
  0x8e   : > { %v181_v10 = vpop.permute.xlu0 %180  ;;  %v366_v38 = vpop.permute.xlu1 %365 }
  0x92   : > { %v176_v17 = vpop.permute.xlu0 %175 }
  0x94   : > { %v520_v49 = vpop.permute.xlu1 %519 }
  0xd7   : > { %v267_v11 = vpop.f32.mrf.mxu0 }
  0xd8   : > { %v344_v12 = vpop.f32.mrf.mxu1  ;;  %v268_v26 = vadd.f32 %v267_v11, %v176_v17 }
  0xd9   : > { %v269_v13 = vpop.f32.mrf.mxu0  ;;  %v345_v27 = vadd.f32 %v344_v12, %v176_v17  ;;  %v700_v12 = vlaneseq }
  0xda   : > { %v346_v14 = vpop.f32.mrf.mxu1  ;;  %v270_v22 = vadd.f32 %v269_v13, %v176_v17  ;;  %v355_v34 = vmax.f32 %v268_v26, 0.0 }
  0xdb   : > { %v273_v15 = vpop.f32.mrf.mxu0  ;;  %v347_v23 = vadd.f32 %v346_v14, %v176_v17  ;;  %v357_v35 = vmax.f32 %v345_v27, 0.0  ;;  %v701_v14 = vshrl.u32 %v700_v12, 7  ;;  %vm722_vm4 = vcmp.lt.s32.totalorder %v700_v12, 512 }
  0xdc   : > { %v350_v16 = vpop.f32.mrf.mxu1  ;;  %v274_v18 = vadd.f32 %v273_v15, %v181_v10  ;;  %v356_v32 = vmax.f32 %v270_v22, 0.0 }
  0xdd   : > { %v351_v19 = vadd.f32 %v350_v16, %v181_v10  ;;  %v275_v20 = vpop.f32.mrf.mxu0  ;;  %v358_v33 = vmax.f32 %v347_v23, 0.0 }
  0xde   : > { %v352_v21 = vpop.f32.mrf.mxu1  ;;  %v276_v24 = vadd.f32 %v275_v20, %v181_v10  ;;  %v359_v30 = vmax.f32 %v274_v18, 0.0 }
  0xdf   : > { %v353_v25 = vadd.f32 %v352_v21, %v181_v10  ;;  %v361_v31 = vmax.f32 %v351_v19, 0.0  ;;  %v1655_v10 = vmov 1966171168  }
  0xe0   : > { %v360_v28 = vmax.f32 %v276_v24, 0.0  ;;  %v698_v11 = vunpack.c.l.s4 %v1655_v10 }
  0xe1   : > { %v362_v29 = vmax.f32 %v353_v25, 0.0 }
  0xe2   : > { %399 = vmatprep.subr.mxu0 %v360_v28  ;;  %v699_v13 = vunpack.c.0.s8 %v698_v11 }
  0xe3   : > { %470 = vmatprep.subr.mxu1 %v362_v29  ;;  %400 = vmatpush1.msra.mxu0 %v359_v30 }
  0xe4   : > { %471 = vmatpush1.msra.mxu1 %v361_v31  ;;  %401 = vmatprep.subr.mxu0 %v356_v32  ;;  %v702_v17 = vsub.s32 %v699_v13, %v701_v14 }
  0xe5   : > { %472 = vmatprep.subr.mxu1 %v358_v33  ;;  %402 = vmatpush1.msra.mxu0 %v355_v34 }
  0xe6   : > { %473 = vmatpush1.msra.mxu1 %v357_v35  ;;  %1289 = vmatmul.mubr.msk.f32.vlgmr.msra.gmra.mxu0 %vm368_vm2, %v171_v8 }
  0xe7   : > { %1290 = vmatmul.mubr.msk.f32.vlgmr.msra.gmra.mxu1 %vm368_vm2, %v171_v8  ;;  %589 = vmatprep.mubr.f32.mxu0 %v1653_v0 }
  0xe8   : > { %660 = vmatprep.mubr.f32.mxu1 %v1653_v0 }
 0x1a6   : > { %v437_v36 = vpop.f32.mrf.mxu0 }
 0x1a7   : > { %v508_v37 = vpop.f32.mrf.mxu1  ;;  %v438_v39 = vadd.f32 %v437_v36, %v366_v38 }
 0x1a8   : > { %v509_v40 = vadd.f32 %v508_v37, %v366_v38  ;;  %v439_v41 = vpop.f32.mrf.mxu0 }
 0x1a9   : > { %v510_v42 = vpop.f32.mrf.mxu1  ;;  %v440_v43 = vadd.f32 %v439_v41, %v366_v38  ;;  %v513_v47 = vmax.f32 %v438_v39, 0.0 }
 0x1aa   : > { %v511_v44 = vadd.f32 %v510_v42, %v366_v38  ;;  %v515_v48 = vmax.f32 %v509_v40, 0.0 }
 0x1ab   : > { %v514_v45 = vmax.f32 %v440_v43, 0.0 }
 0x1ac   : > { %v516_v46 = vmax.f32 %v511_v44, 0.0 }
 0x1ad   : > { %555 = vmatprep.subr.mxu0 %v514_v45 }
 0x1ae   : > { %626 = vmatprep.subr.mxu1 %v516_v46  ;;  %556 = vmatpush1.msra.mxu0 %v513_v47 }
 0x1af   : > { %627 = vmatpush1.msra.mxu1 %v515_v48  ;;  %1291 = vmatmul.mubr.msk.f32.vlgmr.msra.gmra.mxu0 %vm522_vm3, %v172_v9 }
 0x1b0   : > { %1292 = vmatmul.mubr.msk.f32.vlgmr.msra.gmra.mxu1 %vm522_vm3, %v172_v9 }
 0x26f   : > { %v591_v50 = vpop.f32.mrf.mxu0 }
 0x270   : > { %v662_v51 = vpop.f32.mrf.mxu1  ;;  %v592_v52 = vadd.f32 %v591_v50, %v520_v49 }
 0x271   : > { %v663_v53 = vadd.f32 %v662_v51, %v520_v49  ;;  %v593_v54 = vpop.f32.mrf.mxu0 }
 0x272   : > { %v664_v55 = vpop.f32.mrf.mxu1  ;;  %v667_v56 = vsub.f32 0.0, %v592_v52  ;;  %v594_v58 = vadd.f32 %v593_v54, %v520_v49 }
 0x273   : > { %v669_v57 = vsub.f32 0.0, %v663_v53  ;;  %v665_v59 = vadd.f32 %v664_v55, %v520_v49 }
 0x274   : > { %v671_v60 = vmul.f32 1.442695, %v667_v56  ;;  %v668_v62 = vsub.f32 0.0, %v594_v58 }
 0x275   : > { %v675_v61 = vmul.f32 1.442695, %v669_v57  ;;  %v670_v63 = vsub.f32 0.0, %v665_v59 }
 0x276   : > { %1485 = vpow2.f32 %v671_v60  ;;  %v673_v0 = vmul.f32 1.442695, %v668_v62 }
 0x277   : > { %v677_v1 = vmul.f32 1.442695, %v670_v63  ;;  %1487 = vpow2.f32 %v675_v61 }
 0x278   : > { %1489 = vpow2.f32 %v673_v0 }
 0x279   : > { %1491 = vpow2.f32 %v677_v1 }
 0x283   : > { %v1486_v2 = vpop.eup %1485 }
 0x284   : > { %v1488_v3 = vpop.eup %1487  ;;  %v679_v4 = vadd.f32 1.0, %v1486_v2 }
 0x285   : > { %v1490_v5 = vpop.eup %1489  ;;  %v681_v6 = vadd.f32 1.0, %v1488_v3 }
 0x286   : > { %v1492_v7 = vpop.eup %1491  ;;  %1493 = vrcp.f32 %v679_v4  ;;  %v680_v8 = vadd.f32 1.0, %v1490_v5 }
 0x287   : > { %1495 = vrcp.f32 %v681_v6  ;;  %v682_v9 = vadd.f32 1.0, %v1492_v7 }
 0x288   : > { %1497 = vrcp.f32 %v680_v8 }
 0x289   : > { %1499 = vrcp.f32 %v682_v9 }
 0x293   : > { %v1494_v15 = vpop.eup %1493 }
 0x294   : > { %v1496_v16 = vpop.eup %1495 }
 0x295   : > { %v1498_v18 = vpop.eup %1497 }
 0x296   : > { %v1500_v19 = vpop.eup %1499  ;;  %v695_v20 = vcombine.low %v1494_v15, %v1498_v18 }
 0x297   : > { %v696_v21 = vcombine.low %v1496_v16, %v1500_v19 }
 0x298   : > { %v703_v22 = vrot.slane %v695_v20, %v702_v17 }
 0x299   : > { %v710_v23 = vrot.slane %v696_v21, %v702_v17 }
 0x29b   : > { %v711_v24 = vcombine.low %v703_v22, %v710_v23  ;;  %731 = sbr.rel (!%p1695_p4) target bundleno = 818 (0x332), region = 32 }
 0x29d   : > { %v718_v25 = vrot.slane %v711_v24, %v702_v17 }
 0x29f   : > { %724 = vst.msk [vmem:[%s1727_s6] sm:$0xf] %vm722_vm4, %v718_v25 }
 0x2a0   : > { %s2171_s7 = smov (!%p734_p8, %s733_s7), 4 }
 0x2a1   : > { %s1295_s12 = sshll.u32 %s2171_s7, 4 }
 0x2a2   : > { %p1297_p9 = scmp.eq.s32.totalorder %s1295_s12, 0 }
 0x2a3   : > { %p742_p10 = scmp.lt.u32.totalorder (!%p1297_p9), %s2171_s7, 8 }
 0x2a4   : > { %741 = sbr.rel (%p1297_p9) target bundleno = 818 (0x332), region = 36 }
 0x2a9   : > { %745 = sbr.rel (%p742_p10) target bundleno = 809 (0x329), region = 40  ;;  %s1744_s14 = sand.u32 (!%p742_p10), 7, %s2171_s7  }
 0x2aa   : > { %p762_p11 = scmp.eq.s32.totalorder (!%p742_p10), %s1744_s14, 0  ;;  %p1298_p12 = scmp.ne.s32.totalorder (!%p742_p10), %s1744_s14, 0 }
 0x2ae   : > { %765 = sbr.rel (%p1298_p12) target bundleno = 745 (0x2e9), region = 55  ;;  %s766_s15 = sshrl.u32 (!%p1298_p12), %s2171_s7, 3 }
 0x2af   : > { %s1751_s17 = sshrl.u32 (!%p1298_p12), %s766_s15, 6 }
 0x2b0   : > { %p1299_p13 = scmp.le.s32.totalorder (!%p1298_p12), %s1751_s17, 0 }
 0x2b3   : > { %1202 = sbr.rel (%p1299_p13) target bundleno = 729 (0x2d9), region = 136  ;;  %s2157_s18 = smov (!%p1299_p13), %s1737_s9 }
 0x2b4   : > { %s2158_s19 = smov (!%p1299_p13), %s1727_s6  ;;  %s1760_s20 = smov (!%p1299_p13), 0  }
 0x2b5   : > { %s1762_s21 = smov (!%p1299_p13), 0  }
 0x2b8 LB: >> { %v779_v26 = vld [vmem:[%s1595_s19] sm:$0xff]  ;;  %v781_v27 = vld [vmem:[%s1595_s19 + $0x8] sm:$0xff]  ;;  %v783_v28 = vld [vmem:[%s1595_s19 + $0x10] sm:$0xff]  ;;  %s907_s22 = sadd.s32 1, %s1599_s20  ;;  %s773_s21 = sadd.s32 1, %s1603_s21   ;;  %s1603_s21 = sphi %s1762_s21, %s773_s21   ;;  %s1599_s20 = sphi %s1760_s20, %s2161_s20   ;;  %s1595_s19 = sphi %s2158_s19, %s2160_s19   ;;  %s1591_s18 = sphi %s2157_s18, %s2159_s18  }
 0x2b9   : >> { %780 = vst [vmem:[%s1591_s18] sm:$0xff] %v779_v26  ;;  %782 = vst [vmem:[%s1591_s18 + $0x8] sm:$0xff] %v781_v27  ;;  %v785_v29 = vld [vmem:[%s1595_s19 + $0x18] sm:$0xff]  ;;  %v787_v30 = vld [vmem:[%s1595_s19 + $0x20] sm:$0xff]  ;;  %p908_p0 = scmp.ge.s32.totalorder %s907_s22, %s1751_s17  ;;  %p772_p1 = scmp.ge.s32.totalorder %s773_s21, %s1751_s17 }
 0x2ba   : >> { %784 = vst [vmem:[%s1591_s18 + $0x10] sm:$0xff] %v783_v28  ;;  %v789_v31 = vld [vmem:[%s1595_s19 + $0x28] sm:$0xff]  ;;  %786 = vst [vmem:[%s1591_s18 + $0x18] sm:$0xff] %v785_v29  ;;  %v791_v32 = vld [vmem:[%s1595_s19 + $0x30] sm:$0xff] }
 0x2bb   : >> { %788 = vst [vmem:[%s1591_s18 + $0x20] sm:$0xff] %v787_v30  ;;  %790 = vst [vmem:[%s1591_s18 + $0x28] sm:$0xff] %v789_v31  ;;  %v793_v33 = vld [vmem:[%s1595_s19 + $0x38] sm:$0xff]  ;;  %v795_v34 = vld [vmem:[%s1595_s19 + $0x40] sm:$0xff]  ;;  %s2173_s22 = smov (%p908_p0, %s907_s22), 0 }
 0x2bc   : >> { %792 = vst [vmem:[%s1591_s18 + $0x30] sm:$0xff] %v791_v32  ;;  %794 = vst [vmem:[%s1591_s18 + $0x38] sm:$0xff] %v793_v33  ;;  %v797_v35 = vld [vmem:[%s1595_s19 + $0x48] sm:$0xff]  ;;  %v799_v36 = vld [vmem:[%s1595_s19 + $0x50] sm:$0xff]  ;;  %s1300_s23 = sshll.u32 %s2173_s22, 9  ;;  %s2161_s20 = smov %s2173_s22 }
 0x2bd   : >> { %796 = vst [vmem:[%s1591_s18 + $0x40] sm:$0xff] %v795_v34  ;;  %v801_v37 = vld [vmem:[%s1595_s19 + $0x58] sm:$0xff]  ;;  %798 = vst [vmem:[%s1591_s18 + $0x48] sm:$0xff] %v797_v35  ;;  %v803_v38 = vld [vmem:[%s1595_s19 + $0x60] sm:$0xff]  ;;  %s1818_s24 = scalar_lea.vmem %s1727_s6, %s1300_s23 [#allocation2]   ;;  %s1821_s25 = scalar_lea.vmem %s1737_s9, %s1300_s23  }
 0x2be   : >> { %800 = vst [vmem:[%s1591_s18 + $0x50] sm:$0xff] %v799_v36  ;;  %802 = vst [vmem:[%s1591_s18 + $0x58] sm:$0xff] %v801_v37  ;;  %v805_v39 = vld [vmem:[%s1595_s19 + $0x68] sm:$0xff]  ;;  %v807_v40 = vld [vmem:[%s1595_s19 + $0x70] sm:$0xff] }
 0x2bf   : >> { %804 = vst [vmem:[%s1591_s18 + $0x60] sm:$0xff] %v803_v38  ;;  %806 = vst [vmem:[%s1591_s18 + $0x68] sm:$0xff] %v805_v39  ;;  %v809_v41 = vld [vmem:[%s1595_s19 + $0x78] sm:$0xff]  ;;  %v811_v42 = vld [vmem:[%s1595_s19 + $0x80] sm:$0xff] }
 0x2c0   : >> { %808 = vst [vmem:[%s1591_s18 + $0x70] sm:$0xff] %v807_v40  ;;  %v813_v43 = vld [vmem:[%s1595_s19 + $0x88] sm:$0xff]  ;;  %810 = vst [vmem:[%s1591_s18 + $0x78] sm:$0xff] %v809_v41  ;;  %v815_v44 = vld [vmem:[%s1595_s19 + $0x90] sm:$0xff] }
 0x2c1   : >> { %812 = vst [vmem:[%s1591_s18 + $0x80] sm:$0xff] %v811_v42  ;;  %814 = vst [vmem:[%s1591_s18 + $0x88] sm:$0xff] %v813_v43  ;;  %v817_v45 = vld [vmem:[%s1595_s19 + $0x98] sm:$0xff]  ;;  %v819_v46 = vld [vmem:[%s1595_s19 + $0xa0] sm:$0xff] }
 0x2c2   : >> { %816 = vst [vmem:[%s1591_s18 + $0x90] sm:$0xff] %v815_v44  ;;  %818 = vst [vmem:[%s1591_s18 + $0x98] sm:$0xff] %v817_v45  ;;  %v821_v47 = vld [vmem:[%s1595_s19 + $0xa8] sm:$0xff]  ;;  %v823_v48 = vld [vmem:[%s1595_s19 + $0xb0] sm:$0xff] }
 0x2c3   : >> { %820 = vst [vmem:[%s1591_s18 + $0xa0] sm:$0xff] %v819_v46  ;;  %v825_v49 = vld [vmem:[%s1595_s19 + $0xb8] sm:$0xff]  ;;  %822 = vst [vmem:[%s1591_s18 + $0xa8] sm:$0xff] %v821_v47  ;;  %v827_v50 = vld [vmem:[%s1595_s19 + $0xc0] sm:$0xff] }
 0x2c4   : >> { %824 = vst [vmem:[%s1591_s18 + $0xb0] sm:$0xff] %v823_v48  ;;  %826 = vst [vmem:[%s1591_s18 + $0xb8] sm:$0xff] %v825_v49  ;;  %v829_v51 = vld [vmem:[%s1595_s19 + $0xc8] sm:$0xff]  ;;  %v831_v52 = vld [vmem:[%s1595_s19 + $0xd0] sm:$0xff] }
 0x2c5   : >> { %828 = vst [vmem:[%s1591_s18 + $0xc0] sm:$0xff] %v827_v50  ;;  %830 = vst [vmem:[%s1591_s18 + $0xc8] sm:$0xff] %v829_v51  ;;  %v833_v53 = vld [vmem:[%s1595_s19 + $0xd8] sm:$0xff]  ;;  %v835_v54 = vld [vmem:[%s1595_s19 + $0xe0] sm:$0xff] }
 0x2c6   : >> { %832 = vst [vmem:[%s1591_s18 + $0xd0] sm:$0xff] %v831_v52  ;;  %v837_v55 = vld [vmem:[%s1595_s19 + $0xe8] sm:$0xff]  ;;  %834 = vst [vmem:[%s1591_s18 + $0xd8] sm:$0xff] %v833_v53  ;;  %v839_v56 = vld [vmem:[%s1595_s19 + $0xf0] sm:$0xff] }
 0x2c7   : >> { %836 = vst [vmem:[%s1591_s18 + $0xe0] sm:$0xff] %v835_v54  ;;  %838 = vst [vmem:[%s1591_s18 + $0xe8] sm:$0xff] %v837_v55  ;;  %v841_v57 = vld [vmem:[%s1595_s19 + $0xf8] sm:$0xff]  ;;  %v843_v58 = vld [vmem:[%s1595_s19 + $0x100] sm:$0xff] }
 0x2c8   : >> { %840 = vst [vmem:[%s1591_s18 + $0xf0] sm:$0xff] %v839_v56  ;;  %842 = vst [vmem:[%s1591_s18 + $0xf8] sm:$0xff] %v841_v57  ;;  %v845_v59 = vld [vmem:[%s1595_s19 + $0x108] sm:$0xff]  ;;  %v847_v60 = vld [vmem:[%s1595_s19 + $0x110] sm:$0xff] }
 0x2c9   : >> { %844 = vst [vmem:[%s1591_s18 + $0x100] sm:$0xff] %v843_v58  ;;  %v849_v61 = vld [vmem:[%s1595_s19 + $0x118] sm:$0xff]  ;;  %846 = vst [vmem:[%s1591_s18 + $0x108] sm:$0xff] %v845_v59  ;;  %v851_v62 = vld [vmem:[%s1595_s19 + $0x120] sm:$0xff] }
 0x2ca   : >> { %848 = vst [vmem:[%s1591_s18 + $0x110] sm:$0xff] %v847_v60  ;;  %850 = vst [vmem:[%s1591_s18 + $0x118] sm:$0xff] %v849_v61  ;;  %v853_v63 = vld [vmem:[%s1595_s19 + $0x128] sm:$0xff]  ;;  %v855_v0 = vld [vmem:[%s1595_s19 + $0x130] sm:$0xff] }
 0x2cb   : >> { %852 = vst [vmem:[%s1591_s18 + $0x120] sm:$0xff] %v851_v62  ;;  %854 = vst [vmem:[%s1591_s18 + $0x128] sm:$0xff] %v853_v63  ;;  %v857_v1 = vld [vmem:[%s1595_s19 + $0x138] sm:$0xff]  ;;  %v859_v2 = vld [vmem:[%s1595_s19 + $0x140] sm:$0xff] }
 0x2cc   : >> { %856 = vst [vmem:[%s1591_s18 + $0x130] sm:$0xff] %v855_v0  ;;  %v861_v3 = vld [vmem:[%s1595_s19 + $0x148] sm:$0xff]  ;;  %858 = vst [vmem:[%s1591_s18 + $0x138] sm:$0xff] %v857_v1  ;;  %v863_v4 = vld [vmem:[%s1595_s19 + $0x150] sm:$0xff] }
 0x2cd   : >> { %860 = vst [vmem:[%s1591_s18 + $0x140] sm:$0xff] %v859_v2  ;;  %862 = vst [vmem:[%s1591_s18 + $0x148] sm:$0xff] %v861_v3  ;;  %v865_v5 = vld [vmem:[%s1595_s19 + $0x158] sm:$0xff]  ;;  %v867_v6 = vld [vmem:[%s1595_s19 + $0x160] sm:$0xff] }
 0x2ce   : >> { %864 = vst [vmem:[%s1591_s18 + $0x150] sm:$0xff] %v863_v4  ;;  %866 = vst [vmem:[%s1591_s18 + $0x158] sm:$0xff] %v865_v5  ;;  %v869_v7 = vld [vmem:[%s1595_s19 + $0x168] sm:$0xff]  ;;  %v871_v8 = vld [vmem:[%s1595_s19 + $0x170] sm:$0xff] }
 0x2cf   : >> { %868 = vst [vmem:[%s1591_s18 + $0x160] sm:$0xff] %v867_v6  ;;  %v873_v9 = vld [vmem:[%s1595_s19 + $0x178] sm:$0xff]  ;;  %870 = vst [vmem:[%s1591_s18 + $0x168] sm:$0xff] %v869_v7  ;;  %v875_v10 = vld [vmem:[%s1595_s19 + $0x180] sm:$0xff] }
 0x2d0   : >> { %872 = vst [vmem:[%s1591_s18 + $0x170] sm:$0xff] %v871_v8  ;;  %874 = vst [vmem:[%s1591_s18 + $0x178] sm:$0xff] %v873_v9  ;;  %v877_v11 = vld [vmem:[%s1595_s19 + $0x188] sm:$0xff]  ;;  %v879_v12 = vld [vmem:[%s1595_s19 + $0x190] sm:$0xff] }
 0x2d1   : >> { %876 = vst [vmem:[%s1591_s18 + $0x180] sm:$0xff] %v875_v10  ;;  %878 = vst [vmem:[%s1591_s18 + $0x188] sm:$0xff] %v877_v11  ;;  %v881_v13 = vld [vmem:[%s1595_s19 + $0x198] sm:$0xff]  ;;  %v883_v14 = vld [vmem:[%s1595_s19 + $0x1a0] sm:$0xff] }
 0x2d2   : >> { %880 = vst [vmem:[%s1591_s18 + $0x190] sm:$0xff] %v879_v12  ;;  %v885_v15 = vld [vmem:[%s1595_s19 + $0x1a8] sm:$0xff]  ;;  %882 = vst [vmem:[%s1591_s18 + $0x198] sm:$0xff] %v881_v13  ;;  %v887_v16 = vld [vmem:[%s1595_s19 + $0x1b0] sm:$0xff] }
 0x2d3   : >> { %884 = vst [vmem:[%s1591_s18 + $0x1a0] sm:$0xff] %v883_v14  ;;  %886 = vst [vmem:[%s1591_s18 + $0x1a8] sm:$0xff] %v885_v15  ;;  %v889_v17 = vld [vmem:[%s1595_s19 + $0x1b8] sm:$0xff]  ;;  %v891_v18 = vld [vmem:[%s1595_s19 + $0x1c0] sm:$0xff] }
 0x2d4   : >> { %888 = vst [vmem:[%s1591_s18 + $0x1b0] sm:$0xff] %v887_v16  ;;  %890 = vst [vmem:[%s1591_s18 + $0x1b8] sm:$0xff] %v889_v17  ;;  %v893_v19 = vld [vmem:[%s1595_s19 + $0x1c8] sm:$0xff]  ;;  %v895_v20 = vld [vmem:[%s1595_s19 + $0x1d0] sm:$0xff]  ;;  %775 = sbr.rel (!%p772_p1) target bundleno = 696 (0x2b8), region = 142 }
 0x2d5   : >> { %892 = vst [vmem:[%s1591_s18 + $0x1c0] sm:$0xff] %v891_v18  ;;  %v897_v21 = vld [vmem:[%s1595_s19 + $0x1d8] sm:$0xff]  ;;  %894 = vst [vmem:[%s1591_s18 + $0x1c8] sm:$0xff] %v893_v19  ;;  %v899_v22 = vld [vmem:[%s1595_s19 + $0x1e0] sm:$0xff] }
 0x2d6   : >> { %896 = vst [vmem:[%s1591_s18 + $0x1d0] sm:$0xff] %v895_v20  ;;  %898 = vst [vmem:[%s1591_s18 + $0x1d8] sm:$0xff] %v897_v21  ;;  %v901_v23 = vld [vmem:[%s1595_s19 + $0x1e8] sm:$0xff]  ;;  %v903_v24 = vld [vmem:[%s1595_s19 + $0x1f0] sm:$0xff] }
 0x2d7   : >> { %900 = vst [vmem:[%s1591_s18 + $0x1e0] sm:$0xff] %v899_v22  ;;  %902 = vst [vmem:[%s1591_s18 + $0x1e8] sm:$0xff] %v901_v23  ;;  %v905_v25 = vld [vmem:[%s1595_s19 + $0x1f8] sm:$0xff]  ;;  %s2160_s19 = smov %s1818_s24 }
 0x2d8   : >> { %904 = vst [vmem:[%s1591_s18 + $0x1f0] sm:$0xff] %v903_v24  ;;  %906 = vst [vmem:[%s1591_s18 + $0x1f8] sm:$0xff] %v905_v25  ;;  %s2159_s18 = smov %s1821_s25 }
 0x2d9 PF: > { %s1927_s26 = sand.u32 63, %s766_s15   ;;  %s1322_s27 = sshll.u32 %s1751_s17, 13 }
 0x2da   : > { %s918_s28 = sshra.s32 %s1322_s27, 4  ;;  %p1305_p2 = scmp.le.s32.totalorder %s1927_s26, 0 }
 0x2db   : > { %s919_s29 = scalar_lea.vmem %s1727_s6, %s918_s28 [#allocation2]   ;;  %s922_s30 = scalar_lea.vmem %s1737_s9, %s918_s28  }
 0x2dc   : > { %1216 = sbr.rel (%p1305_p2) target bundleno = 745 (0x2e9), region = 147  ;;  %s1605_s3 = smov (!%p1305_p2), %s922_s30  }
 0x2dd   : > { %s1609_s4 = smov (!%p1305_p2), %s919_s29   ;;  %s1613_s5 = smov (!%p1305_p2), 0  }
 0x2de   : > { %s1617_s8 = smov (!%p1305_p2), 0  }
 0x2e1 LB: >> { %v934_v26 = vld [vmem:[%s1611_s4] sm:$0xff]  ;;  %s936_s11 = sadd.s32 1, %s1615_s5  ;;  %s928_s8 = sadd.s32 1, %s1619_s8   ;;  %s1619_s8 = sphi %s1617_s8, %s928_s8   ;;  %s1615_s5 = sphi %s1613_s5, %s1614_s5   ;;  %s1611_s4 = sphi %s1609_s4, %s941_s4   ;;  %s1607_s3 = sphi %s1605_s3, %s942_s3  }
 0x2e2   : >> { %935 = vst [vmem:[%s1607_s3] sm:$0xff] %v934_v26  ;;  %p937_p3 = scmp.ge.s32.totalorder %s936_s11, %s1927_s26  ;;  %p927_p4 = scmp.ge.s32.totalorder %s928_s8, %s1927_s26 }
 0x2e4   : >> { %s2175_s11 = smov (%p937_p3, %s936_s11), 0  ;;  %930 = sbr.rel (!%p927_p4) target bundleno = 737 (0x2e1), region = 153 }
 0x2e5   : >> { %s1306_s12 = sshll.u32 %s2175_s11, 3  ;;  %s1614_s5 = smov %s2175_s11  }
 0x2e6   : >> { %s941_s4 = scalar_lea.vmem %s919_s29, %s1306_s12 [#allocation2]   ;;  %s942_s3 = scalar_lea.vmem %s922_s30, %s1306_s12  }
 0x2e9 PF: > { %945 = sbr.rel (%p762_p11) target bundleno = 809 (0x329), region = 73  ;;  %s1939_s15 = ssub.s32 (!%p762_p11), %s2171_s7, %s1744_s14 }
 0x2ea   : > { %s951_s17 = sshrl.u32 (!%p762_p11), %s2171_s7, 3  ;;  %s948_s18 = scalar_lea.vmem (!%p762_p11), %s1727_s6, %s1939_s15 [#allocation2] }
 0x2eb   : > { %s950_s19 = scalar_lea.vmem (!%p762_p11), %s1737_s9, %s1939_s15  ;;  %s1948_s20 = sshrl.u32 (!%p762_p11), %s951_s17, 6 }
 0x2ec   : > { %p1308_p5 = scmp.le.s32.totalorder (!%p762_p11), %s1948_s20, 0 }
 0x2ee   : > { %1230 = sbr.rel (%p1308_p5) target bundleno = 788 (0x314), region = 158  ;;  %s2162_s21 = smov (!%p1308_p5), %s1737_s9 }
 0x2ef   : > { %s2163_s22 = smov (!%p1308_p5), %s1727_s6  ;;  %s1957_s23 = smov (!%p1308_p5), 0  }
 0x2f0   : > { %s1959_s24 = smov (!%p1308_p5), 0  }
 0x2f3 LB: >> { %v964_v27 = vld [vmem:[%s1627_s22] sm:$0xff]  ;;  %v966_v28 = vld [vmem:[%s1627_s22 + $0x8] sm:$0xff]  ;;  %v968_v29 = vld [vmem:[%s1627_s22 + $0x10] sm:$0xff]  ;;  %s1092_s25 = sadd.s32 1, %s1631_s23  ;;  %s958_s24 = sadd.s32 1, %s1635_s24   ;;  %s1635_s24 = sphi %s1959_s24, %s958_s24   ;;  %s1631_s23 = sphi %s1957_s23, %s2166_s23   ;;  %s1627_s22 = sphi %s2163_s22, %s2165_s22   ;;  %s1623_s21 = sphi %s2162_s21, %s2164_s21  }
 0x2f4   : >> { %965 = vst [vmem:[%s1623_s21] sm:$0xff] %v964_v27  ;;  %967 = vst [vmem:[%s1623_s21 + $0x8] sm:$0xff] %v966_v28  ;;  %v970_v30 = vld [vmem:[%s1627_s22 + $0x18] sm:$0xff]  ;;  %v972_v31 = vld [vmem:[%s1627_s22 + $0x20] sm:$0xff]  ;;  %p1093_p6 = scmp.ge.s32.totalorder %s1092_s25, %s1948_s20  ;;  %p957_p7 = scmp.ge.s32.totalorder %s958_s24, %s1948_s20 }
 0x2f5   : >> { %969 = vst [vmem:[%s1623_s21 + $0x10] sm:$0xff] %v968_v29  ;;  %v974_v32 = vld [vmem:[%s1627_s22 + $0x28] sm:$0xff]  ;;  %971 = vst [vmem:[%s1623_s21 + $0x18] sm:$0xff] %v970_v30  ;;  %v976_v33 = vld [vmem:[%s1627_s22 + $0x30] sm:$0xff] }
 0x2f6   : >> { %973 = vst [vmem:[%s1623_s21 + $0x20] sm:$0xff] %v972_v31  ;;  %975 = vst [vmem:[%s1623_s21 + $0x28] sm:$0xff] %v974_v32  ;;  %v978_v34 = vld [vmem:[%s1627_s22 + $0x38] sm:$0xff]  ;;  %v980_v35 = vld [vmem:[%s1627_s22 + $0x40] sm:$0xff]  ;;  %s2177_s25 = smov (%p1093_p6, %s1092_s25), 0 }
 0x2f7   : >> { %977 = vst [vmem:[%s1623_s21 + $0x30] sm:$0xff] %v976_v33  ;;  %979 = vst [vmem:[%s1623_s21 + $0x38] sm:$0xff] %v978_v34  ;;  %v982_v36 = vld [vmem:[%s1627_s22 + $0x48] sm:$0xff]  ;;  %v984_v37 = vld [vmem:[%s1627_s22 + $0x50] sm:$0xff]  ;;  %s1309_s26 = sshll.u32 %s2177_s25, 9  ;;  %s2166_s23 = smov %s2177_s25 }
 0x2f8   : >> { %981 = vst [vmem:[%s1623_s21 + $0x40] sm:$0xff] %v980_v35  ;;  %v986_v38 = vld [vmem:[%s1627_s22 + $0x58] sm:$0xff]  ;;  %983 = vst [vmem:[%s1623_s21 + $0x48] sm:$0xff] %v982_v36  ;;  %v988_v39 = vld [vmem:[%s1627_s22 + $0x60] sm:$0xff]  ;;  %s2015_s27 = scalar_lea.vmem %s1727_s6, %s1309_s26 [#allocation2]   ;;  %s2018_s28 = scalar_lea.vmem %s1737_s9, %s1309_s26  }
 0x2f9   : >> { %985 = vst [vmem:[%s1623_s21 + $0x50] sm:$0xff] %v984_v37  ;;  %987 = vst [vmem:[%s1623_s21 + $0x58] sm:$0xff] %v986_v38  ;;  %v990_v40 = vld [vmem:[%s1627_s22 + $0x68] sm:$0xff]  ;;  %v992_v41 = vld [vmem:[%s1627_s22 + $0x70] sm:$0xff] }
 0x2fa   : >> { %989 = vst [vmem:[%s1623_s21 + $0x60] sm:$0xff] %v988_v39  ;;  %991 = vst [vmem:[%s1623_s21 + $0x68] sm:$0xff] %v990_v40  ;;  %v994_v42 = vld [vmem:[%s1627_s22 + $0x78] sm:$0xff]  ;;  %v996_v43 = vld [vmem:[%s1627_s22 + $0x80] sm:$0xff] }
 0x2fb   : >> { %993 = vst [vmem:[%s1623_s21 + $0x70] sm:$0xff] %v992_v41  ;;  %v998_v44 = vld [vmem:[%s1627_s22 + $0x88] sm:$0xff]  ;;  %995 = vst [vmem:[%s1623_s21 + $0x78] sm:$0xff] %v994_v42  ;;  %v1000_v45 = vld [vmem:[%s1627_s22 + $0x90] sm:$0xff] }
 0x2fc   : >> { %997 = vst [vmem:[%s1623_s21 + $0x80] sm:$0xff] %v996_v43  ;;  %999 = vst [vmem:[%s1623_s21 + $0x88] sm:$0xff] %v998_v44  ;;  %v1002_v46 = vld [vmem:[%s1627_s22 + $0x98] sm:$0xff]  ;;  %v1004_v47 = vld [vmem:[%s1627_s22 + $0xa0] sm:$0xff] }
 0x2fd   : >> { %1001 = vst [vmem:[%s1623_s21 + $0x90] sm:$0xff] %v1000_v45  ;;  %1003 = vst [vmem:[%s1623_s21 + $0x98] sm:$0xff] %v1002_v46  ;;  %v1006_v48 = vld [vmem:[%s1627_s22 + $0xa8] sm:$0xff]  ;;  %v1008_v49 = vld [vmem:[%s1627_s22 + $0xb0] sm:$0xff] }
 0x2fe   : >> { %1005 = vst [vmem:[%s1623_s21 + $0xa0] sm:$0xff] %v1004_v47  ;;  %v1010_v50 = vld [vmem:[%s1627_s22 + $0xb8] sm:$0xff]  ;;  %1007 = vst [vmem:[%s1623_s21 + $0xa8] sm:$0xff] %v1006_v48  ;;  %v1012_v51 = vld [vmem:[%s1627_s22 + $0xc0] sm:$0xff] }
 0x2ff   : >> { %1009 = vst [vmem:[%s1623_s21 + $0xb0] sm:$0xff] %v1008_v49  ;;  %1011 = vst [vmem:[%s1623_s21 + $0xb8] sm:$0xff] %v1010_v50  ;;  %v1014_v52 = vld [vmem:[%s1627_s22 + $0xc8] sm:$0xff]  ;;  %v1016_v53 = vld [vmem:[%s1627_s22 + $0xd0] sm:$0xff] }
 0x300   : >> { %1013 = vst [vmem:[%s1623_s21 + $0xc0] sm:$0xff] %v1012_v51  ;;  %1015 = vst [vmem:[%s1623_s21 + $0xc8] sm:$0xff] %v1014_v52  ;;  %v1018_v54 = vld [vmem:[%s1627_s22 + $0xd8] sm:$0xff]  ;;  %v1020_v55 = vld [vmem:[%s1627_s22 + $0xe0] sm:$0xff] }
 0x301   : >> { %1017 = vst [vmem:[%s1623_s21 + $0xd0] sm:$0xff] %v1016_v53  ;;  %v1022_v56 = vld [vmem:[%s1627_s22 + $0xe8] sm:$0xff]  ;;  %1019 = vst [vmem:[%s1623_s21 + $0xd8] sm:$0xff] %v1018_v54  ;;  %v1024_v57 = vld [vmem:[%s1627_s22 + $0xf0] sm:$0xff] }
 0x302   : >> { %1021 = vst [vmem:[%s1623_s21 + $0xe0] sm:$0xff] %v1020_v55  ;;  %1023 = vst [vmem:[%s1623_s21 + $0xe8] sm:$0xff] %v1022_v56  ;;  %v1026_v58 = vld [vmem:[%s1627_s22 + $0xf8] sm:$0xff]  ;;  %v1028_v59 = vld [vmem:[%s1627_s22 + $0x100] sm:$0xff] }
 0x303   : >> { %1025 = vst [vmem:[%s1623_s21 + $0xf0] sm:$0xff] %v1024_v57  ;;  %1027 = vst [vmem:[%s1623_s21 + $0xf8] sm:$0xff] %v1026_v58  ;;  %v1030_v60 = vld [vmem:[%s1627_s22 + $0x108] sm:$0xff]  ;;  %v1032_v61 = vld [vmem:[%s1627_s22 + $0x110] sm:$0xff] }
 0x304   : >> { %1029 = vst [vmem:[%s1623_s21 + $0x100] sm:$0xff] %v1028_v59  ;;  %v1034_v62 = vld [vmem:[%s1627_s22 + $0x118] sm:$0xff]  ;;  %1031 = vst [vmem:[%s1623_s21 + $0x108] sm:$0xff] %v1030_v60  ;;  %v1036_v63 = vld [vmem:[%s1627_s22 + $0x120] sm:$0xff] }
 0x305   : >> { %1033 = vst [vmem:[%s1623_s21 + $0x110] sm:$0xff] %v1032_v61  ;;  %1035 = vst [vmem:[%s1623_s21 + $0x118] sm:$0xff] %v1034_v62  ;;  %v1038_v0 = vld [vmem:[%s1627_s22 + $0x128] sm:$0xff]  ;;  %v1040_v1 = vld [vmem:[%s1627_s22 + $0x130] sm:$0xff] }
 0x306   : >> { %1037 = vst [vmem:[%s1623_s21 + $0x120] sm:$0xff] %v1036_v63  ;;  %1039 = vst [vmem:[%s1623_s21 + $0x128] sm:$0xff] %v1038_v0  ;;  %v1042_v2 = vld [vmem:[%s1627_s22 + $0x138] sm:$0xff]  ;;  %v1044_v3 = vld [vmem:[%s1627_s22 + $0x140] sm:$0xff] }
 0x307   : >> { %1041 = vst [vmem:[%s1623_s21 + $0x130] sm:$0xff] %v1040_v1  ;;  %v1046_v4 = vld [vmem:[%s1627_s22 + $0x148] sm:$0xff]  ;;  %1043 = vst [vmem:[%s1623_s21 + $0x138] sm:$0xff] %v1042_v2  ;;  %v1048_v5 = vld [vmem:[%s1627_s22 + $0x150] sm:$0xff] }
 0x308   : >> { %1045 = vst [vmem:[%s1623_s21 + $0x140] sm:$0xff] %v1044_v3  ;;  %1047 = vst [vmem:[%s1623_s21 + $0x148] sm:$0xff] %v1046_v4  ;;  %v1050_v6 = vld [vmem:[%s1627_s22 + $0x158] sm:$0xff]  ;;  %v1052_v7 = vld [vmem:[%s1627_s22 + $0x160] sm:$0xff] }
 0x309   : >> { %1049 = vst [vmem:[%s1623_s21 + $0x150] sm:$0xff] %v1048_v5  ;;  %1051 = vst [vmem:[%s1623_s21 + $0x158] sm:$0xff] %v1050_v6  ;;  %v1054_v8 = vld [vmem:[%s1627_s22 + $0x168] sm:$0xff]  ;;  %v1056_v9 = vld [vmem:[%s1627_s22 + $0x170] sm:$0xff] }
 0x30a   : >> { %1053 = vst [vmem:[%s1623_s21 + $0x160] sm:$0xff] %v1052_v7  ;;  %v1058_v10 = vld [vmem:[%s1627_s22 + $0x178] sm:$0xff]  ;;  %1055 = vst [vmem:[%s1623_s21 + $0x168] sm:$0xff] %v1054_v8  ;;  %v1060_v11 = vld [vmem:[%s1627_s22 + $0x180] sm:$0xff] }
 0x30b   : >> { %1057 = vst [vmem:[%s1623_s21 + $0x170] sm:$0xff] %v1056_v9  ;;  %1059 = vst [vmem:[%s1623_s21 + $0x178] sm:$0xff] %v1058_v10  ;;  %v1062_v12 = vld [vmem:[%s1627_s22 + $0x188] sm:$0xff]  ;;  %v1064_v13 = vld [vmem:[%s1627_s22 + $0x190] sm:$0xff] }
 0x30c   : >> { %1061 = vst [vmem:[%s1623_s21 + $0x180] sm:$0xff] %v1060_v11  ;;  %1063 = vst [vmem:[%s1623_s21 + $0x188] sm:$0xff] %v1062_v12  ;;  %v1066_v14 = vld [vmem:[%s1627_s22 + $0x198] sm:$0xff]  ;;  %v1068_v15 = vld [vmem:[%s1627_s22 + $0x1a0] sm:$0xff] }
 0x30d   : >> { %1065 = vst [vmem:[%s1623_s21 + $0x190] sm:$0xff] %v1064_v13  ;;  %v1070_v16 = vld [vmem:[%s1627_s22 + $0x1a8] sm:$0xff]  ;;  %1067 = vst [vmem:[%s1623_s21 + $0x198] sm:$0xff] %v1066_v14  ;;  %v1072_v17 = vld [vmem:[%s1627_s22 + $0x1b0] sm:$0xff] }
 0x30e   : >> { %1069 = vst [vmem:[%s1623_s21 + $0x1a0] sm:$0xff] %v1068_v15  ;;  %1071 = vst [vmem:[%s1623_s21 + $0x1a8] sm:$0xff] %v1070_v16  ;;  %v1074_v18 = vld [vmem:[%s1627_s22 + $0x1b8] sm:$0xff]  ;;  %v1076_v19 = vld [vmem:[%s1627_s22 + $0x1c0] sm:$0xff] }
 0x30f   : >> { %1073 = vst [vmem:[%s1623_s21 + $0x1b0] sm:$0xff] %v1072_v17  ;;  %1075 = vst [vmem:[%s1623_s21 + $0x1b8] sm:$0xff] %v1074_v18  ;;  %v1078_v20 = vld [vmem:[%s1627_s22 + $0x1c8] sm:$0xff]  ;;  %v1080_v21 = vld [vmem:[%s1627_s22 + $0x1d0] sm:$0xff]  ;;  %960 = sbr.rel (!%p957_p7) target bundleno = 755 (0x2f3), region = 164 }
 0x310   : >> { %1077 = vst [vmem:[%s1623_s21 + $0x1c0] sm:$0xff] %v1076_v19  ;;  %v1082_v22 = vld [vmem:[%s1627_s22 + $0x1d8] sm:$0xff]  ;;  %1079 = vst [vmem:[%s1623_s21 + $0x1c8] sm:$0xff] %v1078_v20  ;;  %v1084_v23 = vld [vmem:[%s1627_s22 + $0x1e0] sm:$0xff] }
 0x311   : >> { %1081 = vst [vmem:[%s1623_s21 + $0x1d0] sm:$0xff] %v1080_v21  ;;  %1083 = vst [vmem:[%s1623_s21 + $0x1d8] sm:$0xff] %v1082_v22  ;;  %v1086_v24 = vld [vmem:[%s1627_s22 + $0x1e8] sm:$0xff]  ;;  %v1088_v25 = vld [vmem:[%s1627_s22 + $0x1f0] sm:$0xff] }
 0x312   : >> { %1085 = vst [vmem:[%s1623_s21 + $0x1e0] sm:$0xff] %v1084_v23  ;;  %1087 = vst [vmem:[%s1623_s21 + $0x1e8] sm:$0xff] %v1086_v24  ;;  %v1090_v26 = vld [vmem:[%s1627_s22 + $0x1f8] sm:$0xff]  ;;  %s2165_s22 = smov %s2015_s27 }
 0x313   : >> { %1089 = vst [vmem:[%s1623_s21 + $0x1f0] sm:$0xff] %v1088_v25  ;;  %1091 = vst [vmem:[%s1623_s21 + $0x1f8] sm:$0xff] %v1090_v26  ;;  %s2164_s21 = smov %s2018_s28 }
 0x314 PF: > { %s2124_s29 = sand.u32 63, %s951_s17   ;;  %s1324_s30 = sshll.u32 %s1948_s20, 13 }
 0x315   : > { %s1103_s3 = sshra.s32 %s1324_s30, 4  ;;  %p1314_p8 = scmp.le.s32.totalorder %s2124_s29, 0 }
 0x316   : > { %s1104_s4 = scalar_lea.vmem %s1727_s6, %s1103_s3 [#allocation2]   ;;  %s1107_s5 = scalar_lea.vmem %s1737_s9, %s1103_s3  }
 0x317   : > { %1244 = sbr.rel (%p1314_p8) target bundleno = 804 (0x324), region = 169  ;;  %s1637_s8 = smov (!%p1314_p8), %s1107_s5  }
 0x318   : > { %s1641_s11 = smov (!%p1314_p8), %s1104_s4   ;;  %s1645_s12 = smov (!%p1314_p8), 0  }
 0x319   : > { %s1649_s24 = smov (!%p1314_p8), 0  }
 0x31c LB: >> { %v1119_v27 = vld [vmem:[%s1643_s11] sm:$0xff]  ;;  %s1121_s17 = sadd.s32 1, %s1647_s12  ;;  %s1113_s24 = sadd.s32 1, %s1651_s24   ;;  %s1651_s24 = sphi %s1649_s24, %s1113_s24   ;;  %s1647_s12 = sphi %s1645_s12, %s1646_s12   ;;  %s1643_s11 = sphi %s1641_s11, %s1126_s11   ;;  %s1639_s8 = sphi %s1637_s8, %s1127_s8  }
 0x31d   : >> { %1120 = vst [vmem:[%s1639_s8] sm:$0xff] %v1119_v27  ;;  %p1122_p9 = scmp.ge.s32.totalorder %s1121_s17, %s2124_s29  ;;  %p1112_p10 = scmp.ge.s32.totalorder %s1113_s24, %s2124_s29 }
 0x31f   : >> { %s2179_s17 = smov (%p1122_p9, %s1121_s17), 0  ;;  %1115 = sbr.rel (!%p1112_p10) target bundleno = 796 (0x31c), region = 175 }
 0x320   : >> { %s1315_s20 = sshll.u32 %s2179_s17, 3  ;;  %s1646_s12 = smov %s2179_s17  }
 0x321   : >> { %s1126_s11 = scalar_lea.vmem %s1104_s4, %s1315_s20 [#allocation2]   ;;  %s1127_s8 = scalar_lea.vmem %s1107_s5, %s1315_s20  }
 0x324 PF: > { %s1656_s21 = smov 1  }
 0x325   : > { %s1128_s22 = sshll.u32 %s1656_s21, %s1744_s14 }
 0x326   : > { %s1317_s23 = sadd.s32 4294967295, %s1128_s22 }
 0x327   : > { %v1138_v28 = vld [vmem:[%s948_s18] sm:%s1317_s23] }
 0x328   : > { %1139 = vst [vmem:[%s950_s19] sm:%s1317_s23] %v1138_v28 }
 0x329 PF: > { %p1318_p11 = scmp.ge.u32.totalorder %s2171_s7, 8 }
 0x32a   : > { %s1657_s25 = smov (!%p1318_p11), 1  }
 0x32b   : > { %748 = sbr.rel (%p1318_p11) target bundleno = 818 (0x332), region = 44  ;;  %s749_s26 = sshll.u32 (!%p1318_p11), %s1657_s25, %s2171_s7 }
 0x32c   : > { %s1319_s27 = sadd.s32 (!%p1318_p11), 4294967295, %s749_s26 }
 0x330   : > { %v759_v29 = vld [vmem:[%s1727_s6] sm:%s1319_s27] }
 0x331   : > { %760 = vst [vmem:[%s1737_s9] sm:%s1319_s27] %v759_v29 }
 0x332 PF: > { %p9_p12 = scmp.ge.s32.totalorder %s1686_s13, 4   ;;  %s2167_s9 = smov %s1583_s10 }
 0x333   : > { %s2168_s10 = smov %s1693_s16  ;;  %s2169_s11 = smov %s1686_s13 }
 0x334   :  { %11 = sbr.rel (!%p9_p12) target bundleno = 2 (0x2), region = 186 }

</bundles_post_ra>
